<compile_context>
chip_gen: v7x
topology: tpu7x:2x2x1
jax: 0.10.0
libtpu: 0.0.40
codegen_flags: <defaults>
</compile_context>

<pallas_src>
import functools

import jax
import jax.numpy as jnp
from jax.experimental import pallas as pl
from jax.experimental.pallas import tpu as pltpu


# ------------------------------------------------------------------ kernel ---
def hourglass_kernel(x_ref, wa_ref, m2_ref, q_ref, pp_ref, out_ref, *,
                     inv_count, n_in_pad, feat):
    f32 = jnp.float32
    mm_dt = wa_ref.dtype                   # matmul operand dtype (bf16 or f32)

    pp = pp_ref[...]                       # (8, n_out_pad) merged small parameters
    gamma_f = pp[0:1, :feat]
    beta_f = pp[1:2, :feat]
    bfc1 = pp[2:3, :feat]                  # fc1 bias zero-padded to 128 lanes
    bfc2 = pp[3:4, :feat]
    btc = pp[4:5, :]                       # tconv bias, o*Lout + t layout, zero-padded
    bconv = pp[5:6, :feat]                 # conv bias, c*L1 + l layout

    # --- Conv1d(Cin->8, k=5, s=3) as a banded matmul; bias added on the VPU --------
    x = x_ref[...]                                                          # (B, n_in_pad)
    h = jnp.dot(x, wa_ref[0:n_in_pad, :], preferred_element_type=f32) + bconv   # (B, 128)

    # --- BatchNorm1d(8), training-mode stats over (batch, length) -------------------
    # One tiny (2,128)@(128,128) pooling matmul; Q[i,j] = 1 iff columns i,j belong to
    # the same channel.  Kept f32 on purpose (exact sums; negligible cost at this size).
    hsum = jnp.sum(h, axis=0, keepdims=True)                                # (1, 128)
    hsq = jnp.sum(h * h, axis=0, keepdims=True)                             # (1, 128)
    stats = jnp.concatenate([hsum, hsq], axis=0)                            # (2, 128)
    moments = jnp.dot(stats, q_ref[...], preferred_element_type=f32) * inv_count
    mean_f = moments[0:1, :]                                                # (1, 128)
    var_f = jnp.maximum(moments[1:2, :] - mean_f * mean_f, 0.0)             # clamp >= 0

    scale = gamma_f * jax.lax.rsqrt(var_f + 1e-5)          # gamma folded into the scale
    h = jnp.maximum(h * scale + (beta_f - mean_f * scale), 0.0)             # BN + ReLU

    # --- fc1 (128 -> 32, zero-padded to lane-dense 128) + ReLU ----------------------
    f1 = jnp.maximum(
        jnp.dot(h.astype(mm_dt), wa_ref[n_in_pad:n_in_pad + feat, :],
                preferred_element_type=f32) + bfc1, 0.0)                    # (B, 128)

    # --- fc2 (32 -> 128, padded rows are zero) + ReLU -------------------------------
    f2 = jnp.maximum(
        jnp.dot(f1.astype(mm_dt), wa_ref[n_in_pad + feat:n_in_pad + 2 * feat, :],
                preferred_element_type=f32) + bfc2, 0.0)                    # (B, 128)

    # --- ConvTranspose1d(8 -> Cout, k=5, s=3) as banded matmul + bias + sigmoid -----
    y = jnp.dot(f2.astype(mm_dt), m2_ref[...], preferred_element_type=f32) + btc
    out_ref[...] = 0.5 * jnp.tanh(0.5 * y) + 0.5            # sigmoid via EUP tanh


# ----------------------------------------------------- operand preparation ---
def _round_up(n, m):
    return ((n + m - 1) // m) * m


def prepare_operands(p, n_ch_in, n_ch_out, length_in, *, matmul_dtype=jnp.bfloat16):
    """Build all x-independent kernel operands once (hoisted out of the hot path)."""
    f32 = jnp.float32
    C1, K, S = 8, 5, 3
    L1 = (length_in - K) // S + 1          # conv output length
    Lout = (L1 - 1) * S + K                # tconv output length
    F = C1 * L1
    assert F == 128, "fc1 expects 128 flattened features (Lin must be 50)"
    n_fc1 = p["w_fc1"].shape[0]            # 32
    n_in = n_ch_in * length_in
    n_in_pad = _round_up(n_in, 128)        # lane-dense input (no ones column)
    n_out = n_ch_out * Lout
    n_out_pad = _round_up(n_out, 128)      # lane-dense output -> unmasked stores

    l = jnp.arange(L1)

    # Conv1d as a banded matrix: M1[i*Lin+t, c*L1+l] = w_conv[c, i, t-3l] if 0<=t-3l<K
    tin = jnp.arange(length_in)
    kin = tin[:, None] - S * l[None, :]
    vin = (kin >= 0) & (kin < K)
    w1g = p["w_conv"][:, :, jnp.clip(kin, 0, K - 1)]                 # (8, Cin, Lin, L1)
    M1 = jnp.where(vin[None, None], w1g, 0.0).transpose(1, 2, 0, 3).reshape(n_in, F)
    M1_aug = jnp.zeros((n_in_pad, F), f32).at[:n_in].set(M1)         # zero-padded rows

    # ConvTranspose1d as a banded matrix: M2[c*L1+l, o*Lout+t] = w_tconv[c, o, t-3l]
    tout = jnp.arange(Lout)
    kout = tout[:, None] - S * l[None, :]
    vout = (kout >= 0) & (kout < K)
    wtg = p["w_tconv"][:, :, jnp.clip(kout, 0, K - 1)]               # (8, Cout, Lout, L1)
    M2 = jnp.where(vout[None, None], wtg, 0.0).transpose(0, 3, 1, 2).reshape(F, n_out)
    M2 = jnp.zeros((F, n_out_pad), f32).at[:, :n_out].set(M2)

    # fc weights, transposed and zero-padded to lane-dense 128x128.
    wfc1 = jnp.zeros((F, F), f32).at[:, :n_fc1].set(p["w_fc1"].T)
    wfc2 = jnp.zeros((F, F), f32).at[:n_fc1, :].set(p["w_fc2"].T)

    # Single stacked weight operand: [conv band | fc1 | fc2].
    wa = jnp.concatenate([M1_aug, wfc1, wfc2], axis=0).astype(matmul_dtype)  # (n_in_pad+256, 128)
    m2 = M2.astype(matmul_dtype)

    # BN pooling matrix: Q[i,j] = 1 iff columns i and j belong to the same channel.
    # Kept f32 (exact channel sums; tiny op).
    ch = jnp.arange(F) // L1
    Q = (ch[:, None] == ch[None, :]).astype(f32)                     # (128, 128)

    # Remaining small parameters merged into one block.
    pp = jnp.zeros((8, n_out_pad), f32)
    pp = pp.at[0, :F].set(jnp.repeat(p["gamma"], L1))
    pp = pp.at[1, :F].set(jnp.repeat(p["beta"], L1))
    pp = pp.at[2, :n_fc1].set(p["b_fc1"])
    pp = pp.at[3, :F].set(p["b_fc2"])
    pp = pp.at[4, :n_out].set(jnp.repeat(p["b_tconv"], Lout))
    pp = pp.at[5, :F].set(jnp.repeat(p["b_conv"], L1))

    meta = dict(L1=L1, Lout=Lout, F=F, n_in=n_in, n_in_pad=n_in_pad,
                n_out=n_out, n_out_pad=n_out_pad, n_ch_out=n_ch_out,
                matmul_dtype=matmul_dtype)
    return dict(wa=wa, m2=m2, q=Q, pp=pp, meta=meta)


# ----------------------------------------------------------------- wrapper ---
def hourglass_forward(x, ops):
    """x: (B, Cin, Lin) float32 NCW.  Returns (B, Cout, Lout) float32."""
    meta = ops["meta"]
    B = x.shape[0]
    n_in, n_in_pad = meta["n_in"], meta["n_in_pad"]
    n_out, n_out_pad = meta["n_out"], meta["n_out_pad"]

    # Single pad op (no scatter copy); bf16 by default = half the input DMA bytes.
    # NOTE: quantizing x to bf16 is deliberate; the conv matmul runs in bf16 anyway.
    x2 = x.reshape(B, n_in).astype(meta["matmul_dtype"])
    x_pad = jnp.pad(x2, ((0, 0), (0, n_in_pad - n_in)))

    kernel = functools.partial(
        hourglass_kernel,
        inv_count=1.0 / float(B * meta["L1"]),
        n_in_pad=n_in_pad,
        feat=meta["F"],
    )
    inputs = (x_pad, ops["wa"], ops["m2"], ops["q"], ops["pp"])

    # Single kernel invocation: no grid, no block pipeline, no double-buffering.
    vmem = pltpu.MemorySpace.VMEM
    out = pl.pallas_call(
        kernel,
        out_shape=jax.ShapeDtypeStruct((B, n_out_pad), jnp.float32),
        in_specs=[pl.BlockSpec(memory_space=vmem) for _ in inputs],
        out_specs=pl.BlockSpec(memory_space=vmem),
    )(*inputs)

    return out[:, :n_out].reshape(B, meta["n_ch_out"], meta["Lout"])


# --------------------------------------------------------- pure-JAX reference
def reference_forward(x, p):
    hp = jax.lax.Precision.HIGHEST
    B = x.shape[0]
    Cout = p["w_tconv"].shape[1]
    L1, K, S = 16, 5, 3
    idx = S * jnp.arange(L1)[:, None] + jnp.arange(K)[None, :]        # (16, 5)
    patches = x[:, :, idx]                                            # (B, Cin, 16, 5)
    h = jnp.einsum("bilk,cik->bcl", patches, p["w_conv"], precision=hp)
    h = h + p["b_conv"][None, :, None]
    mean = jnp.mean(h, axis=(0, 2), keepdims=True)
    var = jnp.mean((h - mean) ** 2, axis=(0, 2), keepdims=True)
    h = (h - mean) / jnp.sqrt(var + 1e-5) * p["gamma"][None, :, None] + p["beta"][None, :, None]
    h = jnp.maximum(h, 0.0)
    flat = h.reshape(B, -1)
    f1 = jnp.maximum(jnp.dot(flat, p["w_fc1"].T, precision=hp) + p["b_fc1"], 0.0)
    f2 = jnp.maximum(jnp.dot(f1, p["w_fc2"].T, precision=hp) + p["b_fc2"], 0.0)
    z = f2.reshape(B, 8, L1)
    contrib = jnp.einsum("bcl,cok->bolk", z, p["w_tconv"], precision=hp)
    y = jnp.zeros((B, Cout, (L1 - 1) * S + K), jnp.float32)
    y = y.at[:, :, idx].add(contrib)                                  # scatter-add (tconv)
    y = y + p["b_tconv"][None, :, None]
    return jax.nn.sigmoid(y)


# -------------------------------------------------------------------- main ---
if __name__ == "__main__":
    B, Cin, Cout, Lin = 2, 4, 4, 50   # Lin=50 -> conv out 16 -> 8*16 = 128 = fc1 in-features
    key = jax.random.PRNGKey(0)
    ks = jax.random.split(key, 11)
    params = dict(
        w_conv=0.2 * jax.random.normal(ks[0], (8, Cin, 5), jnp.float32),
        b_conv=0.1 * jax.random.normal(ks[1], (8,), jnp.float32),
        gamma=1.0 + 0.1 * jax.random.normal(ks[2], (8,), jnp.float32),
        beta=0.1 * jax.random.normal(ks[3], (8,), jnp.float32),
        w_fc1=0.2 * jax.random.normal(ks[4], (32, 128), jnp.float32),
        b_fc1=0.1 * jax.random.normal(ks[5], (32,), jnp.float32),
        w_fc2=0.2 * jax.random.normal(ks[6], (128, 32), jnp.float32),
        b_fc2=0.1 * jax.random.normal(ks[7], (128,), jnp.float32),
        w_tconv=0.2 * jax.random.normal(ks[8], (8, Cout, 5), jnp.float32),
        b_tconv=0.1 * jax.random.normal(ks[9], (Cout,), jnp.float32),
    )
    x = jax.random.normal(ks[10], (B, Cin, Lin), jnp.float32)

    # Operands built once, outside the per-call path (hoisted Toeplitz construction).
    ops_bf16 = prepare_operands(params, Cin, Cout, Lin, matmul_dtype=jnp.bfloat16)
    fwd = jax.jit(functools.partial(hourglass_forward, ops=ops_bf16))

    y = jax.block_until_ready(fwd(x))
    assert y.shape == (B, Cout, 50), y.shape

    y_ref = reference_forward(x, params)

    # Default path uses bf16 MXU operands with f32 accumulation, so compare at a
    # bf16-quantization-level tolerance.
    if not jnp.allclose(y, y_ref, atol=2e-2, rtol=2e-2):
        raise AssertionError(
            f"bf16 kernel mismatch vs reference, max abs err = {float(jnp.max(jnp.abs(y - y_ref)))}"
        )

    # Structural exactness check with f32 MXU operands.
    ops_f32 = prepare_operands(params, Cin, Cout, Lin, matmul_dtype=jnp.float32)
    y32 = jax.block_until_ready(hourglass_forward(x, ops_f32))
    if not jnp.allclose(y32, y_ref, atol=1e-2, rtol=1e-2):
        raise AssertionError(
            f"f32 kernel mismatch vs reference, max abs err = {float(jnp.max(jnp.abs(y32 - y_ref)))}"
        )

    print("KERNEL_OK")
</pallas_src>

<mosaic_0001>
module attributes {stable_mosaic.version = 11 : i64} {
  func.func @hourglass_kernel(%arg0: memref<2x256xbf16, #tpu.memory_space<vmem>>, %arg1: memref<512x128xbf16, #tpu.memory_space<vmem>>, %arg2: memref<128x256xbf16, #tpu.memory_space<vmem>>, %arg3: memref<128x128xf32, #tpu.memory_space<vmem>>, %arg4: memref<8x256xf32, #tpu.memory_space<vmem>>, %arg5: memref<2x256xf32, #tpu.memory_space<vmem>>) attributes {dimension_semantics = [], scalar_prefetch = 0 : i64, scratch_operands = 0 : i64, tpu.core_type = #tpu.core_type<tc>} {
    %c0 = arith.constant 0 : index
    %c0_0 = arith.constant 0 : index
    %0 = vector.load %arg4[%c0, %c0_0] : memref<8x256xf32, #tpu.memory_space<vmem>>, vector<8x256xf32>
    %1 = vector.extract_strided_slice %0 {offsets = [0, 0], sizes = [1, 128], strides = [1, 1]} : vector<8x256xf32> to vector<1x128xf32>
    %2 = vector.extract_strided_slice %0 {offsets = [1, 0], sizes = [1, 128], strides = [1, 1]} : vector<8x256xf32> to vector<1x128xf32>
    %3 = vector.extract_strided_slice %0 {offsets = [2, 0], sizes = [1, 128], strides = [1, 1]} : vector<8x256xf32> to vector<1x128xf32>
    %4 = vector.extract_strided_slice %0 {offsets = [3, 0], sizes = [1, 128], strides = [1, 1]} : vector<8x256xf32> to vector<1x128xf32>
    %5 = vector.extract_strided_slice %0 {offsets = [4, 0], sizes = [1, 256], strides = [1, 1]} : vector<8x256xf32> to vector<1x256xf32>
    %6 = vector.extract_strided_slice %0 {offsets = [5, 0], sizes = [1, 128], strides = [1, 1]} : vector<8x256xf32> to vector<1x128xf32>
    %c0_1 = arith.constant 0 : index
    %c0_2 = arith.constant 0 : index
    %7 = vector.load %arg0[%c0_1, %c0_2] : memref<2x256xbf16, #tpu.memory_space<vmem>>, vector<2x256xbf16>
    %c0_3 = arith.constant 0 : index
    %c0_4 = arith.constant 0 : index
    %8 = vector.load %arg1[%c0_3, %c0_4] : memref<512x128xbf16, #tpu.memory_space<vmem>>, vector<256x128xbf16>
    %cst = arith.constant dense<0.000000e+00> : vector<2x128xf32>
    %9 = tpu.matmul %7, %8, %cst {dimension_numbers = #tpu.dot_dimension_numbers<[1], [0], [0], [1], [0, 0, 1, 1], [], []>} : vector<2x256xbf16>, vector<256x128xbf16>, vector<2x128xf32> -> vector<2x128xf32>
    %10 = vector.broadcast %6 : vector<1x128xf32> to vector<2x128xf32>
    %11 = arith.addf %9, %10 : vector<2x128xf32>
    %cst_5 = arith.constant dense<0.000000e+00> : vector<128xf32>
    %12 = vector.multi_reduction <add>, %11, %cst_5 [0] : vector<2x128xf32> to vector<128xf32>
    %13 = vector.shape_cast %12 : vector<128xf32> to vector<1x128xf32>
    %14 = arith.mulf %11, %11 : vector<2x128xf32>
    %cst_6 = arith.constant dense<0.000000e+00> : vector<128xf32>
    %15 = vector.multi_reduction <add>, %14, %cst_6 [0] : vector<2x128xf32> to vector<128xf32>
    %16 = vector.shape_cast %15 : vector<128xf32> to vector<1x128xf32>
    %17 = tpu.concatenate %13, %16 in 0 : vector<1x128xf32>, vector<1x128xf32> -> vector<2x128xf32>
    %c0_7 = arith.constant 0 : index
    %c0_8 = arith.constant 0 : index
    %18 = vector.load %arg3[%c0_7, %c0_8] : memref<128x128xf32, #tpu.memory_space<vmem>>, vector<128x128xf32>
    %cst_9 = arith.constant dense<0.000000e+00> : vector<2x128xf32>
    %19 = tpu.matmul %17, %18, %cst_9 {dimension_numbers = #tpu.dot_dimension_numbers<[1], [0], [0], [1], [0, 0, 1, 1], [], []>} : vector<2x128xf32>, vector<128x128xf32>, vector<2x128xf32> -> vector<2x128xf32>
    %cst_10 = arith.constant 3.125000e-02 : f32
    %20 = vector.broadcast %cst_10 : f32 to vector<2x128xf32>
    %21 = arith.mulf %19, %20 : vector<2x128xf32>
    %22 = vector.extract_strided_slice %21 {offsets = [0, 0], sizes = [1, 128], strides = [1, 1]} : vector<2x128xf32> to vector<1x128xf32>
    %23 = vector.extract_strided_slice %21 {offsets = [1, 0], sizes = [1, 128], strides = [1, 1]} : vector<2x128xf32> to vector<1x128xf32>
    %24 = arith.mulf %22, %22 : vector<1x128xf32>
    %25 = arith.subf %23, %24 : vector<1x128xf32>
    %cst_11 = arith.constant 0.000000e+00 : f32
    %26 = vector.broadcast %cst_11 : f32 to vector<1x128xf32>
    %27 = arith.maximumf %25, %26 : vector<1x128xf32>
    %cst_12 = arith.constant 9.99999974E-6 : f32
    %28 = vector.broadcast %cst_12 : f32 to vector<1x128xf32>
    %29 = arith.addf %27, %28 : vector<1x128xf32>
    %30 = math.rsqrt %29 : vector<1x128xf32>
    %31 = arith.mulf %1, %30 : vector<1x128xf32>
    %32 = vector.broadcast %31 : vector<1x128xf32> to vector<2x128xf32>
    %33 = arith.mulf %11, %32 : vector<2x128xf32>
    %34 = arith.mulf %22, %31 : vector<1x128xf32>
    %35 = arith.subf %2, %34 : vector<1x128xf32>
    %36 = vector.broadcast %35 : vector<1x128xf32> to vector<2x128xf32>
    %37 = arith.addf %33, %36 : vector<2x128xf32>
    %cst_13 = arith.constant 0.000000e+00 : f32
    %38 = vector.broadcast %cst_13 : f32 to vector<2x128xf32>
    %39 = arith.maximumf %37, %38 : vector<2x128xf32>
    %40 = arith.truncf %39 : vector<2x128xf32> to vector<2x128xbf16>
    %c256 = arith.constant 256 : index
    %c0_14 = arith.constant 0 : index
    %41 = vector.load %arg1[%c256, %c0_14] : memref<512x128xbf16, #tpu.memory_space<vmem>>, vector<128x128xbf16>
    %cst_15 = arith.constant dense<0.000000e+00> : vector<2x128xf32>
    %42 = tpu.matmul %40, %41, %cst_15 {dimension_numbers = #tpu.dot_dimension_numbers<[1], [0], [0], [1], [0, 0, 1, 1], [], []>} : vector<2x128xbf16>, vector<128x128xbf16>, vector<2x128xf32> -> vector<2x128xf32>
    %43 = vector.broadcast %3 : vector<1x128xf32> to vector<2x128xf32>
    %44 = arith.addf %42, %43 : vector<2x128xf32>
    %cst_16 = arith.constant 0.000000e+00 : f32
    %45 = vector.broadcast %cst_16 : f32 to vector<2x128xf32>
    %46 = arith.maximumf %44, %45 : vector<2x128xf32>
    %47 = arith.truncf %46 : vector<2x128xf32> to vector<2x128xbf16>
    %c384 = arith.constant 384 : index
    %c0_17 = arith.constant 0 : index
    %48 = vector.load %arg1[%c384, %c0_17] : memref<512x128xbf16, #tpu.memory_space<vmem>>, vector<128x128xbf16>
    %cst_18 = arith.constant dense<0.000000e+00> : vector<2x128xf32>
    %49 = tpu.matmul %47, %48, %cst_18 {dimension_numbers = #tpu.dot_dimension_numbers<[1], [0], [0], [1], [0, 0, 1, 1], [], []>} : vector<2x128xbf16>, vector<128x128xbf16>, vector<2x128xf32> -> vector<2x128xf32>
    %50 = vector.broadcast %4 : vector<1x128xf32> to vector<2x128xf32>
    %51 = arith.addf %49, %50 : vector<2x128xf32>
    %cst_19 = arith.constant 0.000000e+00 : f32
    %52 = vector.broadcast %cst_19 : f32 to vector<2x128xf32>
    %53 = arith.maximumf %51, %52 : vector<2x128xf32>
    %54 = arith.truncf %53 : vector<2x128xf32> to vector<2x128xbf16>
    %c0_20 = arith.constant 0 : index
    %c0_21 = arith.constant 0 : index
    %55 = vector.load %arg2[%c0_20, %c0_21] : memref<128x256xbf16, #tpu.memory_space<vmem>>, vector<128x256xbf16>
    %cst_22 = arith.constant dense<0.000000e+00> : vector<2x256xf32>
    %56 = tpu.matmul %54, %55, %cst_22 {dimension_numbers = #tpu.dot_dimension_numbers<[1], [0], [0], [1], [0, 0, 1, 1], [], []>} : vector<2x128xbf16>, vector<128x256xbf16>, vector<2x256xf32> -> vector<2x256xf32>
    %57 = vector.broadcast %5 : vector<1x256xf32> to vector<2x256xf32>
    %58 = arith.addf %56, %57 : vector<2x256xf32>
    %cst_23 = arith.constant 5.000000e-01 : f32
    %59 = vector.broadcast %cst_23 : f32 to vector<2x256xf32>
    %60 = arith.mulf %59, %58 : vector<2x256xf32>
    %61 = math.tanh %60 : vector<2x256xf32>
    %cst_24 = arith.constant 5.000000e-01 : f32
    %62 = vector.broadcast %cst_24 : f32 to vector<2x256xf32>
    %63 = arith.mulf %62, %61 : vector<2x256xf32>
    %cst_25 = arith.constant 5.000000e-01 : f32
    %64 = vector.broadcast %cst_25 : f32 to vector<2x256xf32>
    %65 = arith.addf %63, %64 : vector<2x256xf32>
    %c0_26 = arith.constant 0 : index
    %c0_27 = arith.constant 0 : index
    %66 = vector.load %arg5[%c0_26, %c0_27] : memref<2x256xf32, #tpu.memory_space<vmem>>, vector<2x256xf32>
    tpu.vector_store %arg5[%c0_26, %c0_27], %65 {strides = array<i32>} : memref<2x256xf32, #tpu.memory_space<vmem>>, vector<2x256xf32>,
    return
  }
}

</mosaic_0001>

<bundles_post_ra>
// kernel: hourglass_forward.1
= control target key start
LH: loop header
LB: loop body
LE: loop exit
PB: predicated region body
PF: predicated region fallthrough
CT: control target
= control target key end

     0   :  { %10 = vsyncpa [#allocation3], 0  ;;  %s1059_s18 = smov [#allocation2]   ;;  %s1318_s0 = inlined_call_operand.vmem [shape: bf16[2,256], index: 0, kind: input, shape index: {}]   ;;  %s1319_s1 = inlined_call_operand.vmem [shape: bf16[512,128], index: 1, kind: input, shape index: {}]   ;;  %s1320_s2 = inlined_call_operand.vmem [shape: bf16[128,256], index: 2, kind: input, shape index: {}]   ;;  %s1321_s3 = inlined_call_operand.hbm [shape: f32[128,128], index: 3, kind: input, shape index: {}]   ;;  %s1322_s4 = inlined_call_operand.vmem [shape: f32[8,256], index: 4, kind: input, shape index: {}]   ;;  %s1323_s5 = inlined_call_operand.vmem [shape: f32[2,256], index: 5, kind: output, shape index: {}]  }
   0x1   :  { %s22_s19 = sshll.u32 %s1059_s18, 4  ;;  %s1035_s22 = scalar_lea.hbm %s1321_s3, 2048  ;;  %s23_s19 = int_to_ptr.vmem [resolvable:$true] %s22_s19 }
   0x2   :  { %p1036_p0 = scmp.ne.s32.totalorder %s1321_s3, %s1035_s22  ;;  %p1039_p1 = scmp.lt.u32.totalorder %s1035_s22, %s1321_s3 }
   0x4   :  { %p1041_p2 = pnand %p1039_p1, %p1036_p0 }
   0x6   :  { %1044 = shalt.err (!%p1041_p2)
}
   0x7   :  { %s1045_s27 = scalar_lea.vmem %s23_s19, 2048  ;;  %p1050_p4 = scmp.lt.s32.totalorder %s23_s19, %s23_s19 }
   0x8   :  { %p1046_p3 = scmp.ne.s32.totalorder %s23_s19, %s1045_s27  ;;  %p1051_p5 = scmp.lt.s32.totalorder %s1045_s27, %s1045_s27 }
   0xa   :  { %p1052_p6 = por %p1051_p5, %p1050_p4 }
   0xc   :  { %p1053_p7 = pnand %p1052_p6, %p1046_p3 }
   0xe   :  { %1056 = shalt.err (!%p1053_p7)
}
   0xf   :  { %s1060_s28 = smov 128   ;;  %s1061_s29 = smov 8  }
  0x10   :  { %28 = dma.hbm_to_vmem [thread:$0]  %s1321_s3, 2048, %s23_s19, [#allocation3], %s1060_s28, %s1060_s28, %s1061_s29  }
  0x11   :  { %1057 = dma.done.wait [#allocation3], 2048  }
  0x12   :  { %1058 = vsyncadd [#allocation3], 4294965248  ;;  %v1062_v0 = vmov 0.0|0.0   ;;  %v973_v1 = vld [vmem:[%s1319_s1 + $0x40] sm:$0xff]   ;;  %v975_v3 = vld [vmem:[%s1319_s1 + $0x48] sm:$0xff]   ;;  %v70_v7 = vlaneseq  ;;  %vm1064_vm0 = vmmov 0  }
  0x13   :  { %941 = vmatprep.subr.bf16.mxu1 %v1062_v0  ;;  %v974_v2 = vld [vmem:[%s1319_s1] sm:$0xff]   ;;  %809 = vmatprep.subr.bf16.mxu0 %v973_v1  ;;  %v976_v4 = vld [vmem:[%s1319_s1 + $0x8] sm:$0xff]   ;;  %v977_v5 = vld [vmem:[%s1319_s1 + $0x50] sm:$0xff]   ;;  %v1063_v8 = vmov 1966171168   ;;  %v1065_v50 = vmov 0.0  }
  0x14   :  { %810 = vmatpush3.bf16.msra.mxu0 %v974_v2  ;;  %v978_v6 = vld [vmem:[%s1319_s1 + $0x10] sm:$0xff]   ;;  %v84_v9 = vunpack.c.l.s4 %v1063_v8  ;;  %v979_v10 = vld [vmem:[%s1319_s1 + $0x58] sm:$0xff]   ;;  %v1134_v12 = vshrl.u32 %v70_v7, 7  ;;  %v981_v14 = vld [vmem:[%s1319_s1 + $0x60] sm:$0xff]   ;;  %898 = vmatprep.mubr.msk.f32.mxu1 %vm1064_vm0, %v1065_v50  ;;  %vm235_vm1 = vcmask 1041408   ;;  %vm251_vm2 = vcmask 1040384  }
  0x15   :  { %811 = vmatprep.subr.bf16.mxu0 %v975_v3  ;;  %v980_v11 = vld [vmem:[%s1319_s1 + $0x18] sm:$0xff]   ;;  %v982_v15 = vld [vmem:[%s1319_s1 + $0x20] sm:$0xff]   ;;  %v983_v16 = vld [vmem:[%s1319_s1 + $0x68] sm:$0xff]  }
  0x16   :  { %v85_v13 = vunpack.c.0.s8 %v84_v9  ;;  %v759_v18 = vld.sshfl [vmem:[%s1318_s0] sm:$0x11 pattern:$0x75316420]  ;;  %v254_v20 = vld [vmem:[#allocation2 + $0x8] sm:$0xff]  ;;  %v255_v24 = vld [vmem:[#allocation2 + $0x10] sm:$0xff] }
  0x17   :  { %v253_v19 = vld [vmem:[#allocation2] sm:$0xff]  ;;  %v984_v21 = vld [vmem:[%s1319_s1 + $0x28] sm:$0xff]   ;;  %v82_v22 = vcombine.high %v759_v18, %v759_v18  ;;  %v256_v25 = vld [vmem:[#allocation2 + $0x18] sm:$0xff]  ;;  %v72_v52 = vsub.s32 5, %v1134_v12 }
  0x18   :  { %812 = vmatpush3.bf16.msra.mxu0 %v976_v4  ;;  %v88_v17 = vsub.s32 %v85_v13, %v1134_v12  ;;  %v942_v23 = vpack.c.bf16 %v254_v20, %v253_v19  ;;  %v985_v26 = vld [vmem:[%s1319_s1 + $0x70] sm:$0xff]   ;;  %v257_v27 = vld [vmem:[#allocation2 + $0x20] sm:$0xff]  ;;  %v258_v28 = vld [vmem:[#allocation2 + $0x28] sm:$0xff]  ;;  %v945_v30 = vpack.c.bf16 %v256_v25, %v255_v24 }
  0x19   :  { %813 = vmatprep.subr.bf16.mxu0 %v977_v5  ;;  %v986_v31 = vld [vmem:[%s1319_s1 + $0x30] sm:$0xff]   ;;  %v987_v32 = vld [vmem:[%s1319_s1 + $0x78] sm:$0xff]   ;;  %v948_v33 = vpack.c.bf16 %v258_v28, %v257_v27  ;;  %v261_v39 = vld [vmem:[#allocation2 + $0x40] sm:$0xff] }
  0x1a   :  { %v96_v29 = vrot.slane %v82_v22, %v88_v17  ;;  %943 = vmatpush3.bf16.msra.mxu1 %v942_v23  ;;  %v988_v34 = vld [vmem:[%s1319_s1 + $0x38] sm:$0xff]   ;;  %v89_v35 = vrot.slane %v759_v18, %v88_v17  ;;  %v259_v36 = vld [vmem:[#allocation2 + $0x30] sm:$0xff]  ;;  %v262_v40 = vld [vmem:[#allocation2 + $0x48] sm:$0xff] }
  0x1b   :  { %944 = vmatprep.subr.bf16.mxu1 %v1062_v0  ;;  %v260_v37 = vld [vmem:[#allocation2 + $0x38] sm:$0xff]  ;;  %v954_v41 = vpack.c.bf16 %v262_v40, %v261_v39  ;;  %v263_v42 = vld [vmem:[#allocation2 + $0x50] sm:$0xff]  ;;  %v265_v45 = vld [vmem:[#allocation2 + $0x60] sm:$0xff]  ;;  %v354_v39 = vsub.s32 0, %v1134_v12 }
  0x1c   :  { %814 = vmatpush3.bf16.msra.mxu0 %v978_v6  ;;  %227 = vmatprep.mubr.bf16.mxu0 %v96_v29  ;;  %v951_v38 = vpack.c.bf16 %v260_v37, %v259_v36  ;;  %v264_v43 = vld [vmem:[#allocation2 + $0x58] sm:$0xff]  ;;  %v266_v46 = vld [vmem:[#allocation2 + $0x68] sm:$0xff]  ;;  %v267_v48 = vld [vmem:[#allocation2 + $0x70] sm:$0xff] }
  0x1d   :  { %815 = vmatprep.subr.bf16.mxu0 %v979_v10  ;;  %v957_v44 = vpack.c.bf16 %v264_v43, %v263_v42  ;;  %v960_v47 = vpack.c.bf16 %v266_v46, %v265_v45  ;;  %v268_v49 = vld [vmem:[#allocation2 + $0x78] sm:$0xff]  ;;  %v1181_v53 = vld [vmem:[%s1322_s4] sm:$0xff]  ;;  %v994_v19 = vld [vmem:[%s1319_s1 + $0xa8] sm:$0xff]   ;;  %v364_v43 = vsub.s32 1, %v1134_v12 }
  0x1e   :  { %946 = vmatpush3.bf16.msra.mxu1 %v945_v30  ;;  %v963_v51 = vpack.c.bf16 %v268_v49, %v267_v48  ;;  %v73_v55 = vrot.slane %v1181_v53, %v72_v52  ;;  %v992_v17 = vld [vmem:[%s1319_s1 + $0x98] sm:$0xff]   ;;  %v993_v18 = vld [vmem:[%s1319_s1 + $0xa0] sm:$0xff]   ;;  %v995_v20 = vld [vmem:[%s1319_s1 + $0xb0] sm:$0xff]  }
  0x1f   :  { %947 = vmatprep.subr.bf16.mxu1 %v1062_v0  ;;  %v997_v22 = vld [vmem:[%s1319_s1 + $0xc0] sm:$0xff]   ;;  %v998_v23 = vld [vmem:[%s1319_s1 + $0xc8] sm:$0xff]   ;;  %v999_v24 = vld [vmem:[%s1319_s1 + $0xd0] sm:$0xff]  }
  0x20   :  { %816 = vmatpush3.bf16.msra.mxu0 %v980_v11  ;;  %v1000_v25 = vld [vmem:[%s1319_s1 + $0xd8] sm:$0xff]   ;;  %v1002_v27 = vld [vmem:[%s1319_s1 + $0xe8] sm:$0xff]  }
  0x21   :  { %817 = vmatprep.subr.bf16.mxu0 %v981_v14  ;;  %v989_v14 = vld [vmem:[%s1319_s1 + $0x80] sm:$0xff]   ;;  %v1004_v52 = vld [vmem:[%s1319_s1 + $0xf8] sm:$0xff]  }
  0x22   :  { %949 = vmatpush3.bf16.msra.mxu1 %v948_v33 }
  0x23   :  { %950 = vmatprep.subr.bf16.mxu1 %v1062_v0 }
  0x24   :  { %818 = vmatpush3.bf16.msra.mxu0 %v982_v15  ;;  %v990_v15 = vld [vmem:[%s1319_s1 + $0x88] sm:$0xff]  }
  0x25   :  { %819 = vmatprep.subr.bf16.mxu0 %v983_v16  ;;  %v991_v16 = vld [vmem:[%s1319_s1 + $0x90] sm:$0xff]  }
  0x26   :  { %952 = vmatpush3.bf16.msra.mxu1 %v951_v38 }
  0x27   :  { %953 = vmatprep.subr.bf16.mxu1 %v1062_v0 }
  0x28   :  { %820 = vmatpush3.bf16.msra.mxu0 %v984_v21  ;;  %v996_v21 = vld [vmem:[%s1319_s1 + $0xb8] sm:$0xff]  }
  0x29   :  { %821 = vmatprep.subr.bf16.mxu0 %v985_v26  ;;  %v1001_v26 = vld [vmem:[%s1319_s1 + $0xe0] sm:$0xff]  }
  0x2a   :  { %955 = vmatpush3.bf16.msra.mxu1 %v954_v41 }
  0x2b   :  { %956 = vmatprep.subr.bf16.mxu1 %v1062_v0 }
  0x2c   :  { %822 = vmatpush3.bf16.msra.mxu0 %v986_v31 }
  0x2d   :  { %823 = vmatprep.subr.bf16.mxu0 %v987_v32 }
  0x2e   :  { %958 = vmatpush3.bf16.msra.mxu1 %v957_v44 }
  0x2f   :  { %959 = vmatprep.subr.bf16.mxu1 %v1062_v0 }
  0x30   :  { %824 = vmatpush3.bf16.msra.mxu0 %v988_v34 }
  0x31   :  { %901 = vmatprep.subr.bf16.mxu0 %v1065_v50 }
  0x32   :  { %961 = vmatpush3.bf16.msra.mxu1 %v960_v47 }
  0x33   :  { %228 = vmatmul.mubr.bf16.vlgmr.msra.gmra.mrb[0].mxu0 %v89_v35  ;;  %962 = vmatprep.subr.bf16.mxu1 %v1062_v0 }
  0x34   :  { %917 = vmatprep.mubr.msk.bf16.mxu0 %vm1064_vm0, %v1065_v50  ;;  %902 = vmatpush3.bf16.msra.mxu0 %v989_v14  ;;  %v1026_v14 = vld [vmem:[%s1320_s2 + $0x70] ss:$8 sps:$4 sm:$0xff]  }
  0x35   :  { %903 = vmatprep.subr.bf16.mxu0 %v1065_v50 }
  0x36   :  { %964 = vmatpush3.bf16.msra.mxu1 %v963_v51  ;;  %v1003_v51 = vld [vmem:[%s1319_s1 + $0xf0] sm:$0xff]  }
  0x37   :  { %921 = vmatprep.subr.bf16.mxu1 %v1065_v50 }
  0x38   :  { %904 = vmatpush3.bf16.msra.mxu0 %v990_v15  ;;  %v1066_v15 = vmov 0  }
  0x39   :  { %905 = vmatprep.subr.bf16.mxu0 %v1065_v50 }
  0x3c   :  { %906 = vmatpush3.bf16.msra.mxu0 %v991_v16  ;;  %v497_v16 = vsub.s32 3, %v1134_v12 }
  0x3d   :  { %907 = vmatprep.subr.bf16.mxu0 %v1065_v50 }
  0x40   :  { %908 = vmatpush3.bf16.msra.mxu0 %v992_v17  ;;  %v498_v17 = vrot.slane %v1181_v53, %v497_v16 }
  0x41   :  { %909 = vmatprep.subr.bf16.mxu0 %v1065_v50 }
  0x44   :  { %910 = vmatpush3.bf16.msra.mxu0 %v993_v18 }
  0x45   :  { %911 = vmatprep.subr.bf16.mxu0 %v1065_v50 }
  0x48   :  { %912 = vmatpush3.bf16.msra.mxu0 %v994_v19 }
  0x49   :  { %913 = vmatprep.subr.bf16.mxu0 %v1065_v50 }
  0x4c   :  { %914 = vmatpush3.bf16.msra.mxu0 %v995_v20 }
  0x4d   :  { %915 = vmatprep.subr.bf16.mxu0 %v1065_v50 }
  0x50   :  { %916 = vmatpush3.bf16.msra.mxu0 %v996_v21 }
 0x106   :  { %v825_v54 = vpop.f32.mrb[0].mxu0 }
 0x107   :  { %v826_v56 = vpop.f32.mrb[1].mxu0 }
 0x108   :  { %v827_v57 = vadd.f32 %v826_v56, %v825_v54  ;;  %v828_v58 = vpop.f32.mrb[2].mxu0  ;;  %v1005_v54 = vld [vmem:[%s1320_s2] ss:$8 sps:$4 sm:$0xff]   ;;  %v1010_v56 = vld [vmem:[%s1320_s2 + $0x14] ss:$8 sps:$4 sm:$0xff]  }
 0x109   :  { %v829_v59 = vpop.f32.mrb[3].mxu0  ;;  %v1011_v58 = vld [vmem:[%s1320_s2 + $0x20] ss:$8 sps:$4 sm:$0xff]  }
 0x10a   :  { %v1184_v60 = vadd.f32 %v827_v57, %v73_v55  ;;  %v1007_v55 = vld [vmem:[%s1320_s2 + $0x4] ss:$8 sps:$4 sm:$0xff]   ;;  %v1016_v59 = vld [vmem:[%s1320_s2 + $0x34] ss:$8 sps:$4 sm:$0xff]  }
 0x10b   :  { %693 = vmatprep.subr.bf16.mxu0 %v1007_v55  ;;  %v1013_v57 = vld [vmem:[%s1320_s2 + $0x24] ss:$8 sps:$4 sm:$0xff]  }
 0x10c   :  { %v236_v61 = vsel %vm235_vm1, %v1184_v60, 0.0  ;;  %v243_v62 = vmul.f32 %v1184_v60, %v1184_v60 }
 0x10d   :  { %v237_v63 = vrot.slane %v236_v61, 4 }
 0x10e   :  { %v244_v0 = vsel %vm235_vm1, %v243_v62, 0.0  ;;  %v1017_v62 = vld [vmem:[%s1320_s2 + $0x40] ss:$8 sps:$4 sm:$0xff]  }
 0x10f   :  { %v238_v1 = vadd.f32 %v237_v63, %v236_v61  ;;  %v245_v2 = vrot.slane %v244_v0, 4  ;;  %v1019_v61 = vld [vmem:[%s1320_s2 + $0x44] ss:$8 sps:$4 sm:$0xff]   ;;  %v1022_v63 = vld [vmem:[%s1320_s2 + $0x54] ss:$8 sps:$4 sm:$0xff]  }
 0x111   :  { %v239_v3 = vrot.slane %v238_v1, 2  ;;  %v246_v4 = vadd.f32 %v245_v2, %v244_v0  ;;  %v1020_v0 = vld [vmem:[%s1320_s2 + $0x50] ss:$8 sps:$4 sm:$0xff]   ;;  %v1023_v2 = vld [vmem:[%s1320_s2 + $0x60] ss:$8 sps:$4 sm:$0xff]  }
 0x113   :  { %v240_v5 = vadd.f32 %v239_v3, %v238_v1  ;;  %v247_v6 = vrot.slane %v246_v4, 2  ;;  %v1025_v1 = vld [vmem:[%s1320_s2 + $0x64] ss:$8 sps:$4 sm:$0xff]   ;;  %v387_v3 = vsub.s32 2, %v1134_v12 }
 0x115   :  { %v241_v7 = vrot.slane %v240_v5, 1  ;;  %v248_v8 = vadd.f32 %v247_v6, %v246_v4  ;;  %v388_v4 = vrot.slane %v1181_v53, %v387_v3 }
 0x117   :  { %v249_v9 = vrot.slane %v248_v8, 1  ;;  %v242_v10 = vadd.f32 %v241_v7, %v240_v5 }
 0x119   :  { %v250_v11 = vadd.f32 %v249_v9, %v248_v8 }
 0x11b   :  { %v252_v13 = vsel %vm251_vm2, %v242_v10, %v250_v11 }
 0x11c   :  { %899 = vmatmul.mubr.f32.vlgmr.msra.gmra.mrb[0].mxu1 %v252_v13  ;;  %v1028_v13 = vld [vmem:[%s1320_s2 + $0x74] ss:$8 sps:$4 sm:$0xff]  }
 0x11d   :  { %937 = vmatprep.mubr.msk.bf16.mxu1 %vm1064_vm0, %v1065_v50  ;;  %922 = vmatpush3.bf16.msra.mxu1 %v997_v22 }
 0x11e   :  { %923 = vmatprep.subr.bf16.mxu1 %v1065_v50 }
 0x121   :  { %924 = vmatpush3.bf16.msra.mxu1 %v998_v23 }
 0x122   :  { %925 = vmatprep.subr.bf16.mxu1 %v1065_v50 }
 0x125   :  { %926 = vmatpush3.bf16.msra.mxu1 %v999_v24 }
 0x126   :  { %927 = vmatprep.subr.bf16.mxu1 %v1065_v50 }
 0x129   :  { %928 = vmatpush3.bf16.msra.mxu1 %v1000_v25  ;;  %v607_v25 = vsub.s32 4, %v1134_v12 }
 0x12a   :  { %929 = vmatprep.subr.bf16.mxu1 %v1065_v50 }
 0x12d   :  { %930 = vmatpush3.bf16.msra.mxu1 %v1001_v26  ;;  %v36_v26 = vld [vmem:[%s1322_s4 + $0x8] sm:$0xff] }
 0x12e   :  { %931 = vmatprep.subr.bf16.mxu1 %v1065_v50 }
 0x131   :  { %932 = vmatpush3.bf16.msra.mxu1 %v1002_v27  ;;  %v608_v27 = vrot.slane %v1181_v53, %v607_v25 }
 0x132   :  { %933 = vmatprep.subr.bf16.mxu1 %v1065_v50 }
 0x135   :  { %934 = vmatpush3.bf16.msra.mxu1 %v1003_v51 }
 0x136   :  { %935 = vmatprep.subr.bf16.mxu1 %v1065_v50  ;;  %v1008_v50 = vld [vmem:[%s1320_s2 + $0x10] ss:$8 sps:$4 sm:$0xff]  }
 0x139   :  { %936 = vmatpush3.bf16.msra.mxu1 %v1004_v52 }
 0x1ef   :  { %v335_v28 = vpop.f32.mrb[0].mxu1 }
 0x1f0   :  { %v339_v29 = vmul.f32 0.03125, %v335_v28  ;;  %v900_v30 = vpop.f32.mrb[1].mxu1  ;;  %v612_v28 = vrot.slane %v36_v26, %v607_v25 }
 0x1f2   :  { %v340_v31 = vmul.f32 %v339_v29, %v339_v29 }
 0x1f4   :  { %v342_v32 = vrot.slane %v340_v31, 7 }
 0x1f6   :  { %v344_v33 = vsub.f32 %v339_v29, %v342_v32 }
 0x1f8   :  { %v345_v34 = vmax.f32 %v344_v33, 0.0 }
 0x1fa   :  { %v346_v35 = vadd.f32 1e-05, %v345_v34 }
 0x1fc   :  { %1029 = vrsqrt.f32 %v346_v35 }
 0x206   :  { %v1030_v36 = vpop.eup %1029 }
 0x207   :  { %v349_v37 = vrot.slane %v1030_v36, 1 }
 0x209   :  { %v351_v38 = vmul.f32 %v349_v37, %v1181_v53 }
 0x20b   :  { %v357_v40 = vmul.f32 %v351_v38, %v339_v29  ;;  %v355_v41 = vrot.slane %v351_v38, %v354_v39 }
 0x20d   :  { %v359_v42 = vrot.slane %v357_v40, 7  ;;  %v356_v46 = vmul.f32 %v355_v41, %v1184_v60  ;;  %v1014_v60 = vld [vmem:[%s1320_s2 + $0x30] ss:$8 sps:$4 sm:$0xff]  }
 0x20f   :  { %v361_v44 = vsub.f32 %v1181_v53, %v359_v42 }
 0x211   :  { %v365_v45 = vrot.slane %v361_v44, %v364_v43 }
 0x213   :  { %v366_v47 = vadd.f32 %v365_v45, %v356_v46 }
 0x215   :  { %v367_v48 = vmax.f32 %v366_v47, 0.0 }
 0x217   :  { %v368_v49 = vpack.c.bf16 %v367_v48, %v367_v48 }
 0x219   :  { %918 = vmatmul.mubr.bf16.vlgmr.msra.gmra.mrb[4].mxu0 %v368_v49 }
 0x21a   :  { %694 = vmatpush1.bf16.msra.mxu0 %v1005_v54  ;;  %725 = vmatprep.mubr.bf16.mxu0 %v1066_v15 }
 0x21b   :  { %695 = vmatprep.subr.bf16.mxu0 %v1010_v56 }
 0x21e   :  { %696 = vmatpush1.bf16.msra.mxu0 %v1008_v50 }
 0x21f   :  { %697 = vmatprep.subr.bf16.mxu0 %v1013_v57 }
 0x222   :  { %698 = vmatpush1.bf16.msra.mxu0 %v1011_v58 }
 0x223   :  { %699 = vmatprep.subr.bf16.mxu0 %v1016_v59 }
 0x226   :  { %700 = vmatpush1.bf16.msra.mxu0 %v1014_v60 }
 0x227   :  { %701 = vmatprep.subr.bf16.mxu0 %v1019_v61 }
 0x22a   :  { %702 = vmatpush1.bf16.msra.mxu0 %v1017_v62 }
 0x22b   :  { %703 = vmatprep.subr.bf16.mxu0 %v1022_v63 }
 0x22e   :  { %704 = vmatpush1.bf16.msra.mxu0 %v1020_v0 }
 0x22f   :  { %705 = vmatprep.subr.bf16.mxu0 %v1025_v1 }
 0x232   :  { %706 = vmatpush1.bf16.msra.mxu0 %v1023_v2 }
 0x233   :  { %707 = vmatprep.subr.bf16.mxu0 %v1028_v13 }
 0x236   :  { %708 = vmatpush1.bf16.msra.mxu0 %v1026_v14 }
 0x2ec   :  { %v471_v5 = vpop.f32.mrb[4].mxu0 }
 0x2ed   :  { %v472_v6 = vadd.f32 %v471_v5, %v388_v4  ;;  %v919_v7 = vpop.f32.mrb[5].mxu0 }
 0x2ee   :  { %v474_v8 = vpop.f32.mrb[6].mxu0 }
 0x2ef   :  { %v477_v9 = vmax.f32 %v472_v6, 0.0  ;;  %v920_v10 = vpop.f32.mrb[7].mxu0 }
 0x2f1   :  { %v478_v11 = vpack.c.bf16 %v477_v9, %v477_v9 }
 0x2f3   :  { %938 = vmatmul.mubr.bf16.vlgmr.msra.gmra.mrb[4].mxu1 %v478_v11 }
 0x3c6   :  { %v581_v18 = vpop.f32.mrb[4].mxu1 }
 0x3c7   :  { %v582_v19 = vadd.f32 %v581_v18, %v498_v17  ;;  %v939_v20 = vpop.f32.mrb[5].mxu1 }
 0x3c8   :  { %v584_v21 = vpop.f32.mrb[6].mxu1 }
 0x3c9   :  { %v587_v22 = vmax.f32 %v582_v19, 0.0  ;;  %v940_v23 = vpop.f32.mrb[7].mxu1 }
 0x3cb   :  { %v588_v24 = vpack.c.bf16 %v587_v22, %v587_v22 }
 0x3cd   :  { %726 = vmatmul.mubr.bf16.vlgmr.msra.gmra.mrb[8].mxu0 %v588_v24 }
 0x4a0   :  { %v727_v29 = vpop.f32.mrb[8].mxu0 }
 0x4a1   :  { %v728_v30 = vadd.f32 %v727_v29, %v608_v27  ;;  %v729_v31 = vpop.f32.mrb[9].mxu0 }
 0x4a2   :  { %v730_v32 = vadd.f32 %v729_v31, %v612_v28  ;;  %v731_v33 = vpop.f32.mrb[10].mxu0 }
 0x4a3   :  { %v734_v34 = vmul.f32 0.5, %v728_v30  ;;  %v732_v35 = vpop.f32.mrb[11].mxu0 }
 0x4a4   :  { %v735_v36 = vmul.f32 0.5, %v730_v32 }
 0x4a5   :  { %1031 = vtanh.f32 %v734_v34 }
 0x4a6   :  { %1033 = vtanh.f32 %v735_v36 }
 0x4af   :  { %v1032_v37 = vpop.eup %1031 }
 0x4b0   :  { %v1034_v38 = vpop.eup %1033  ;;  %v738_v12 = vmul.f32 0.5, %v1032_v37 }
 0x4b1   :  { %v739_v39 = vmul.f32 0.5, %v1034_v38 }
 0x4b2   :  { %v740_v40 = vadd.f32 0.5, %v738_v12 }
 0x4b3   :  { %v741_v41 = vadd.f32 0.5, %v739_v39 }
 0x4b5   :  { %v744_v42 = vcombine.low %v740_v40, %v741_v41 }
 0x4b7   :  { %808 = vst.sshfl [vmem:[%s1323_s5] sm:$0x33 pattern:$0x76325410] %v744_v42 }
 0x4b8   :  { %758 = vsyncpa [#allocation3], 1 }

</bundles_post_ra>
